<compile_context>
chip_gen: v7x
topology: tpu7x:2x2x1
jax: 0.10.0
libtpu: 0.0.40
codegen_flags: <defaults>
</compile_context>

<pallas_src>
import functools

import jax
import jax.numpy as jnp
from jax import lax
from jax.experimental import pallas as pl
from jax.experimental.pallas import tpu as pltpu

# ----------------------------- configuration -----------------------------
BS = 2                      # batch size
N_HEADS = 4                 # heads
D_MODEL = 32                # model width
D_K = D_MODEL // N_HEADS    # 8  (head_dim = d_k = d_v)
D_V = D_K
Q_LEN = 8                   # max_q_len
SEQ_LEN = 8                 # seq_len
BH = BS * N_HEADS           # fused batch*heads axis


# ----------------------------- kernel -----------------------------
def _sdpa_kernel(q_ref, k_ref, v_ref, *out_refs, scale, with_attn):
    # q: [BH, Q_LEN, D_K]   k: [BH, D_K, SEQ_LEN]   v: [BH, SEQ_LEN, D_V]
    q = q_ref[...]
    k = k_ref[...]
    v = v_ref[...]

    # attn_scores = matmul(q, k) * scale  (one batched MXU op over BH; f32 acc).
    scores = lax.dot_general(
        q, k, (((2,), (1,)), ((0,), (0,))),
        preferred_element_type=jnp.float32) * scale          # [BH, Q, S] f32

    # Numerically stable softmax over the last axis, kept in f32 (v5e-safe).
    m = jnp.max(scores, axis=-1, keepdims=True)
    e = jnp.exp(scores - m)
    denom = jnp.sum(e, axis=-1, keepdims=True)
    attn = e / denom                                         # exact: attn is returned

    # output = matmul(attn, v)  (one batched MXU op over BH; f32 acc).
    out = lax.dot_general(
        attn.astype(v.dtype), v, (((2,), (1,)), ((0,), (0,))),
        preferred_element_type=jnp.float32)                  # [BH, Q, D_V] f32

    # Lane-dense stores: collapse the trailing (Q, 8) dims so each output is a
    # single contiguous [BH, Q*8] slab instead of 8 masked 8-lane row stores.
    bh, ql, dv = out.shape
    seq = attn.shape[-1]
    out_refs[0][...] = out.reshape(bh, ql * dv).astype(out_refs[0].dtype)
    if with_attn:
        out_refs[1][...] = attn.reshape(bh, ql * seq).astype(out_refs[1].dtype)


# ----------------------------- wrapper -----------------------------
def scaled_dot_product_attention(q, k, v, scale, return_attn=True):
    """q: [bs, h, q_len, d_k], k: [bs, h, d_k, seq_len], v: [bs, h, seq_len, d_v].

    res_attention=False path of the PyTorch module:
      returns (output [bs,h,q_len,d_v], attn [bs,h,q_len,seq_len]).
    With return_attn=False only `output` is produced (attn writeback skipped).
    `scale` is a compile-time constant (lsa=False).
    """
    bs, nh, qlen, dk = q.shape
    klen = k.shape[-1]
    dv = v.shape[-1]
    bh = bs * nh

    # Fuse bs*heads into one leading batch axis (pure reshape, no transpose, no cast).
    qf = q.reshape(bh, qlen, dk)
    kf = k.reshape(bh, dk, klen)
    vf = v.reshape(bh, klen, dv)

    out_shapes = [jax.ShapeDtypeStruct((bh, qlen * dv), q.dtype)]
    out_specs = [pl.BlockSpec(memory_space=pltpu.MemorySpace.VMEM)]
    if return_attn:
        out_shapes.append(jax.ShapeDtypeStruct((bh, qlen * klen), q.dtype))
        out_specs.append(pl.BlockSpec(memory_space=pltpu.MemorySpace.VMEM))

    kernel = functools.partial(_sdpa_kernel, scale=float(scale),
                               with_attn=return_attn)

    results = pl.pallas_call(
        kernel,
        out_shape=tuple(out_shapes),
        in_specs=[pl.BlockSpec(memory_space=pltpu.MemorySpace.VMEM),   # q
                  pl.BlockSpec(memory_space=pltpu.MemorySpace.VMEM),   # k
                  pl.BlockSpec(memory_space=pltpu.MemorySpace.VMEM)],  # v
        out_specs=tuple(out_specs),
    )(qf, kf, vf)

    if not isinstance(results, (tuple, list)):
        results = (results,)

    out = results[0].reshape(bs, nh, qlen, dv)
    if return_attn:
        attn = results[1].reshape(bs, nh, qlen, klen)
        return out, attn
    return out


# ----------------------------- pure-JAX reference -----------------------------
def reference_sdpa(q, k, v, scale):
    scores = jnp.einsum('bhqd,bhdk->bhqk', q, k) * scale
    attn = jax.nn.softmax(scores, axis=-1)
    out = jnp.einsum('bhqk,bhkv->bhqv', attn, v)
    return out, attn


# ----------------------------- main -----------------------------
if __name__ == "__main__":
    key = jax.random.PRNGKey(0)
    kq, kk, kv = jax.random.split(key, 3)

    # Shapes implied by the module (d_model=32, n_heads=4 -> head_dim=8):
    #   q: [bs, n_heads, max_q_len, d_k]
    #   k: [bs, n_heads, d_k, seq_len]   (already transposed, as in the PyTorch caller)
    #   v: [bs, n_heads, seq_len, d_v]
    q = jax.random.normal(kq, (BS, N_HEADS, Q_LEN, D_K), jnp.float32)
    k = jax.random.normal(kk, (BS, N_HEADS, D_K, SEQ_LEN), jnp.float32)
    v = jax.random.normal(kv, (BS, N_HEADS, SEQ_LEN, D_V), jnp.float32)
    scale = float(D_K) ** -0.5          # nn.Parameter(head_dim ** -0.5), lsa=False

    fn = jax.jit(scaled_dot_product_attention,
                 static_argnames=("scale", "return_attn"))

    out, attn = fn(q, k, v, scale=scale)
    out = jax.block_until_ready(out)
    attn = jax.block_until_ready(attn)

    assert out.shape == (BS, N_HEADS, Q_LEN, D_V)
    assert attn.shape == (BS, N_HEADS, Q_LEN, SEQ_LEN)

    ref_out, ref_attn = reference_sdpa(q, k, v, scale)
    if not jnp.allclose(out, ref_out, rtol=1e-2, atol=1e-2):
        raise AssertionError(
            f"output mismatch, max|diff|={float(jnp.max(jnp.abs(out - ref_out)))}")
    if not jnp.allclose(attn, ref_attn, rtol=1e-2, atol=1e-2):
        raise AssertionError(
            f"attn mismatch, max|diff|={float(jnp.max(jnp.abs(attn - ref_attn)))}")
    # attention rows sum to 1 (exact softmax denominator)
    row_sums = jnp.sum(attn, axis=-1)
    if not jnp.allclose(row_sums, jnp.ones_like(row_sums), rtol=1e-4, atol=1e-4):
        raise AssertionError("attn rows do not sum to 1")

    # output-only path (attn writeback dropped)
    out_only = jax.block_until_ready(fn(q, k, v, scale=scale, return_attn=False))
    assert out_only.shape == (BS, N_HEADS, Q_LEN, D_V)
    if not jnp.allclose(out_only, ref_out, rtol=1e-2, atol=1e-2):
        raise AssertionError("output-only path mismatch")

    print("KERNEL_OK")
</pallas_src>

<mosaic_0001>
module attributes {stable_mosaic.version = 11 : i64} {
  func.func @_sdpa_kernel(%arg0: memref<8x8x8xf32, #tpu.memory_space<vmem>>, %arg1: memref<8x8x8xf32, #tpu.memory_space<vmem>>, %arg2: memref<8x8x8xf32, #tpu.memory_space<vmem>>, %arg3: memref<8x64xf32, #tpu.memory_space<vmem>>, %arg4: memref<8x64xf32, #tpu.memory_space<vmem>>) attributes {dimension_semantics = [], scalar_prefetch = 0 : i64, scratch_operands = 0 : i64, tpu.core_type = #tpu.core_type<tc>} {
    %c0 = arith.constant 0 : index
    %c0_0 = arith.constant 0 : index
    %c0_1 = arith.constant 0 : index
    %0 = vector.load %arg0[%c0, %c0_0, %c0_1] : memref<8x8x8xf32, #tpu.memory_space<vmem>>, vector<8x8x8xf32>
    %c0_2 = arith.constant 0 : index
    %c0_3 = arith.constant 0 : index
    %c0_4 = arith.constant 0 : index
    %1 = vector.load %arg1[%c0_2, %c0_3, %c0_4] : memref<8x8x8xf32, #tpu.memory_space<vmem>>, vector<8x8x8xf32>
    %c0_5 = arith.constant 0 : index
    %c0_6 = arith.constant 0 : index
    %c0_7 = arith.constant 0 : index
    %2 = vector.load %arg2[%c0_5, %c0_6, %c0_7] : memref<8x8x8xf32, #tpu.memory_space<vmem>>, vector<8x8x8xf32>
    %cst = arith.constant dense<0.000000e+00> : vector<8x8x8xf32>
    %3 = tpu.matmul %0, %1, %cst {dimension_numbers = #tpu.dot_dimension_numbers<[2], [1], [1], [2], [0, 0, 0, 1, 1, 2], [0], [0]>} : vector<8x8x8xf32>, vector<8x8x8xf32>, vector<8x8x8xf32> -> vector<8x8x8xf32>
    %cst_8 = arith.constant 0.353553385 : f32
    %4 = vector.broadcast %cst_8 : f32 to vector<8x8x8xf32>
    %5 = arith.mulf %3, %4 : vector<8x8x8xf32>
    %cst_9 = arith.constant dense<0xFF800000> : vector<8x8xf32>
    %6 = vector.multi_reduction <maximumf>, %5, %cst_9 [2] : vector<8x8x8xf32> to vector<8x8xf32>
    %7 = vector.shape_cast %6 : vector<8x8xf32> to vector<8x8x1xf32>
    %8 = vector.broadcast %7 : vector<8x8x1xf32> to vector<8x8x8xf32>
    %9 = arith.subf %5, %8 : vector<8x8x8xf32>
    %10 = math.exp %9 : vector<8x8x8xf32>
    %cst_10 = arith.constant dense<0.000000e+00> : vector<8x8xf32>
    %11 = vector.multi_reduction <add>, %10, %cst_10 [2] : vector<8x8x8xf32> to vector<8x8xf32>
    %12 = vector.shape_cast %11 : vector<8x8xf32> to vector<8x8x1xf32>
    %13 = vector.broadcast %12 : vector<8x8x1xf32> to vector<8x8x8xf32>
    %14 = arith.divf %10, %13 : vector<8x8x8xf32>
    %cst_11 = arith.constant dense<0.000000e+00> : vector<8x8x8xf32>
    %15 = tpu.matmul %14, %2, %cst_11 {dimension_numbers = #tpu.dot_dimension_numbers<[2], [1], [1], [2], [0, 0, 0, 1, 1, 2], [0], [0]>} : vector<8x8x8xf32>, vector<8x8x8xf32>, vector<8x8x8xf32> -> vector<8x8x8xf32>
    %16 = vector.shape_cast %15 : vector<8x8x8xf32> to vector<8x64xf32>
    %c0_12 = arith.constant 0 : index
    %c0_13 = arith.constant 0 : index
    %17 = vector.load %arg3[%c0_12, %c0_13] : memref<8x64xf32, #tpu.memory_space<vmem>>, vector<8x64xf32>
    tpu.vector_store %arg3[%c0_12, %c0_13], %16 {strides = array<i32>} : memref<8x64xf32, #tpu.memory_space<vmem>>, vector<8x64xf32>,
    %18 = vector.shape_cast %14 : vector<8x8x8xf32> to vector<8x64xf32>
    %c0_14 = arith.constant 0 : index
    %c0_15 = arith.constant 0 : index
    %19 = vector.load %arg4[%c0_14, %c0_15] : memref<8x64xf32, #tpu.memory_space<vmem>>, vector<8x64xf32>
    tpu.vector_store %arg4[%c0_14, %c0_15], %18 {strides = array<i32>} : memref<8x64xf32, #tpu.memory_space<vmem>>, vector<8x64xf32>,
    return
  }
}

</mosaic_0001>

<bundles_post_ra>
// kernel: scaled_dot_product_attention.1
= control target key start
LH: loop header
LB: loop body
LE: loop exit
PB: predicated region body
PF: predicated region fallthrough
CT: control target
= control target key end

     0   :  { %10 = vsyncpa [#allocation3], 0  ;;  %s2238_s0 = inlined_call_operand.hbm [shape: f32[8,8,8], index: 0, kind: input, shape index: {}]   ;;  %s2239_s1 = inlined_call_operand.hbm [shape: f32[8,8,8], index: 1, kind: input, shape index: {}]   ;;  %s2240_s2 = inlined_call_operand.hbm [shape: f32[8,8,8], index: 2, kind: input, shape index: {}]   ;;  %s2241_s3 = inlined_call_operand.vmem [shape: f32[8,64], index: 3, kind: output, shape index: {0}]   ;;  %s2242_s4 = inlined_call_operand.vmem [shape: f32[8,64], index: 4, kind: output, shape index: {1}]  }
   0x1   :  { %11 = vsyncpa [#allocation5], 0  ;;  %s1952_s15 = smov [#allocation4]   ;;  %s1953_s17 = smov [#allocation2]  }
   0x2   :  { %s29_s16 = sshll.u32 %s1952_s15, 4  ;;  %s17_s18 = sshll.u32 %s1953_s17, 4  ;;  %s30_s16 = int_to_ptr.vmem [resolvable:$true] %s29_s16  ;;  %s1992_s18 = int_to_ptr.vmem [resolvable:$true] %s17_s18 }
   0x3   :  { %s1882_s21 = scalar_lea.hbm %s2239_s1, 1024 }
   0x4   :  { %p1883_p0 = scmp.ne.s32.totalorder %s2239_s1, %s1882_s21  ;;  %p1886_p1 = scmp.lt.u32.totalorder %s1882_s21, %s2239_s1 }
   0x6   :  { %p1888_p2 = pnand %p1886_p1, %p1883_p0 }
   0x8   :  { %1891 = shalt.err (!%p1888_p2)
}
   0x9   :  { %s1892_s26 = scalar_lea.vmem %s30_s16, 1024  ;;  %p1897_p4 = scmp.lt.s32.totalorder %s30_s16, %s30_s16 }
   0xa   :  { %p1893_p3 = scmp.ne.s32.totalorder %s30_s16, %s1892_s26  ;;  %p1898_p5 = scmp.lt.s32.totalorder %s1892_s26, %s1892_s26 }
   0xc   :  { %p1899_p6 = por %p1898_p5, %p1897_p4 }
   0xe   :  { %p1900_p7 = pnand %p1899_p6, %p1893_p3 }
  0x10   :  { %1903 = shalt.err (!%p1900_p7)
}
  0x11   :  { %s1954_s27 = smov 128   ;;  %s1955_s28 = smov 8  }
  0x12   :  { %35 = dma.hbm_to_vmem [thread:$0]  %s2239_s1, 1024, %s30_s16, [#allocation5], %s1954_s27, %s1954_s27, %s1955_s28  }
  0x13   :  { %s1904_s7 = scalar_lea.hbm %s2238_s0, 1024 }
  0x14   :  { %p1905_p8 = scmp.ne.s32.totalorder %s2238_s0, %s1904_s7  ;;  %p1908_p9 = scmp.lt.u32.totalorder %s1904_s7, %s2238_s0 }
  0x16   :  { %p1910_p10 = pnand %p1908_p9, %p1905_p8 }
  0x18   :  { %1913 = shalt.err (!%p1910_p10)
}
  0x19   :  { %s1914_s12 = scalar_lea.vmem %s1992_s18, 1024  ;;  %p1919_p12 = scmp.lt.s32.totalorder %s1992_s18, %s1992_s18 }
  0x1a   :  { %p1915_p11 = scmp.ne.s32.totalorder %s1992_s18, %s1914_s12  ;;  %p1920_p13 = scmp.lt.s32.totalorder %s1914_s12, %s1914_s12 }
  0x1c   :  { %p1921_p0 = por %p1920_p13, %p1919_p12 }
  0x1e   :  { %p1922_p1 = pnand %p1921_p0, %p1915_p11 }
  0x20   :  { %1925 = shalt.err (!%p1922_p1)
}
  0x21   :  { %23 = dma.hbm_to_vmem [thread:$0]  %s2238_s0, 1024, %s1992_s18, [#allocation3], %s1954_s27, %s1954_s27, %s1955_s28  }
  0x22   :  { %s1956_s14 = smov [#allocation6]   ;;  %s1926_s19 = scalar_lea.hbm %s2240_s2, 1024 }
  0x23   :  { %s41_s15 = sshll.u32 %s1956_s14, 4  ;;  %p1927_p2 = scmp.ne.s32.totalorder %s2240_s2, %s1926_s19  ;;  %s42_s15 = int_to_ptr.vmem [resolvable:$true] %s41_s15 }
  0x24   :  { %p1930_p3 = scmp.lt.u32.totalorder %s1926_s19, %s2240_s2 }
  0x26   :  { %p1932_p4 = pnand %p1930_p3, %p1927_p2 }
  0x28   :  { %1935 = shalt.err (!%p1932_p4)
}
  0x29   :  { %s1936_s24 = scalar_lea.vmem %s42_s15, 1024  ;;  %p1941_p6 = scmp.lt.s32.totalorder %s42_s15, %s42_s15 }
  0x2a   :  { %p1937_p5 = scmp.ne.s32.totalorder %s42_s15, %s1936_s24  ;;  %p1942_p7 = scmp.lt.s32.totalorder %s1936_s24, %s1936_s24 }
  0x2c   :  { %p1943_p8 = por %p1942_p7, %p1941_p6 }
  0x2e   :  { %p1944_p9 = pnand %p1943_p8, %p1937_p5 }
  0x30   :  { %1947 = shalt.err (!%p1944_p9)
}
  0x31   :  { %47 = dma.hbm_to_vmem [thread:$0]  %s2240_s2, 1024, %s42_s15, [#allocation5], %s1954_s27, %s1954_s27, %s1955_s28  }
  0x32   :  { %1948 = dma.done.wait [#allocation3], 1024  }
  0x33   :  { %1949 = vsyncadd [#allocation3], 4294966272 }
  0x34   :  { %1950 = dma.done.wait [#allocation5], 2048  }
  0x35   :  { %1951 = vsyncadd [#allocation5], 4294965248  ;;  %v1957_v0 = vmov 0.0   ;;  %vm1958_vm0 = vmmov 0   ;;  %vm81_vm1 = vcmask 64512   ;;  %v65_v1 = vld [vmem:[#allocation4] sm:$0xff] }
  0x36   :  { %1755 = vmatprep.subr.mxu0 %v1957_v0  ;;  %1757 = vmatprep.mubr.msk.f32.mxu0 %vm1958_vm0, %v1957_v0  ;;  %v57_v2 = vld [vmem:[#allocation2] sm:$0xff]  ;;  %v67_v3 = vld [vmem:[#allocation4 + $0x10] sm:$0xff]  ;;  %v66_v4 = vld [vmem:[#allocation4 + $0x8] sm:$0xff]  ;;  %s1961_s2 = smov 16   ;;  %s1962_s25 = smov 24   ;;  %vm1511_vm2 = vcmask 130048  }
  0x37   :  { %1760 = vmatprep.subr.mxu1 %v1957_v0  ;;  %1762 = vmatprep.mubr.msk.f32.mxu1 %vm1958_vm0, %v1957_v0  ;;  %v58_v5 = vld [vmem:[#allocation2 + $0x8] sm:$0xff]  ;;  %v59_v6 = vld [vmem:[#allocation2 + $0x10] sm:$0xff]  ;;  %v68_v7 = vld [vmem:[#allocation4 + $0x18] sm:$0xff]  ;;  %s1963_s26 = smov 32   ;;  %s1964_s27 = smov 40   ;;  %vm1513_vm3 = vcmask 195584  }
  0x38   :  { %1756 = vmatpush3.msra.mxu0 %v65_v1  ;;  %1761 = vmatpush3.msra.mxu1 %v66_v4  ;;  %v69_v8 = vld [vmem:[#allocation4 + $0x20] sm:$0xff]  ;;  %v60_v9 = vld [vmem:[#allocation2 + $0x18] sm:$0xff]  ;;  %v70_v11 = vld [vmem:[#allocation4 + $0x28] sm:$0xff]  ;;  %s1965_s29 = smov 48   ;;  %s1966_s30 = smov 56   ;;  %vm1515_vm4 = vcmask 261120  }
  0x39   :  { %1758 = vmatmul.mubr.msk.f32.vlgmr.msra.gmra.mrb[0].mxu0 %vm81_vm1, %v57_v2  ;;  %1765 = vmatprep.subr.mxu0 %v1957_v0  ;;  %v61_v10 = vld [vmem:[#allocation2 + $0x20] sm:$0xff]  ;;  %v71_v12 = vld [vmem:[#allocation4 + $0x30] sm:$0xff]  ;;  %v62_v13 = vld [vmem:[#allocation2 + $0x28] sm:$0xff]  ;;  %vm1517_vm5 = vcmask 326656   ;;  %vm1519_vm6 = vcmask 392192   ;;  %vm1521_vm7 = vcmask 457728  }
  0x3a   :  { %1766 = vmatpush3.msra.mxu0 %v67_v3  ;;  %1767 = vmatprep.mubr.msk.f32.mxu0 %vm1958_vm0, %v1957_v0  ;;  %v63_v14 = vld [vmem:[#allocation2 + $0x30] sm:$0xff]  ;;  %v72_v15 = vld [vmem:[#allocation4 + $0x38] sm:$0xff]  ;;  %vm1523_vm8 = vcmask 523264  }
  0x3b   :  { %1763 = vmatmul.mubr.msk.f32.vlgmr.msra.gmra.mrb[0].mxu1 %vm81_vm1, %v58_v5  ;;  %1770 = vmatprep.subr.mxu1 %v1957_v0  ;;  %v64_v16 = vld [vmem:[#allocation2 + $0x38] sm:$0xff] }
  0x3c   :  { %1775 = vmatprep.subr.mxu0 %v1957_v0  ;;  %1771 = vmatpush3.msra.mxu1 %v68_v7 }
  0x3d   :  { %1768 = vmatmul.mubr.msk.f32.vlgmr.msra.gmra.mrb[2].mxu0 %vm81_vm1, %v59_v6  ;;  %1772 = vmatprep.mubr.msk.f32.mxu1 %vm1958_vm0, %v1957_v0 }
  0x3e   :  { %1776 = vmatpush3.msra.mxu0 %v69_v8  ;;  %1777 = vmatprep.mubr.msk.f32.mxu0 %vm1958_vm0, %v1957_v0 }
  0x3f   :  { %1773 = vmatmul.mubr.msk.f32.vlgmr.msra.gmra.mrb[2].mxu1 %vm81_vm1, %v60_v9  ;;  %1780 = vmatprep.subr.mxu1 %v1957_v0 }
  0x40   :  { %1785 = vmatprep.subr.mxu0 %v1957_v0  ;;  %1781 = vmatpush3.msra.mxu1 %v70_v11 }
  0x41   :  { %1778 = vmatmul.mubr.msk.f32.vlgmr.msra.gmra.mrb[4].mxu0 %vm81_vm1, %v61_v10  ;;  %1782 = vmatprep.mubr.msk.f32.mxu1 %vm1958_vm0, %v1957_v0 }
  0x42   :  { %1786 = vmatpush3.msra.mxu0 %v71_v12  ;;  %1787 = vmatprep.mubr.msk.f32.mxu0 %vm1958_vm0, %v1957_v0 }
  0x43   :  { %1783 = vmatmul.mubr.msk.f32.vlgmr.msra.gmra.mrb[4].mxu1 %vm81_vm1, %v62_v13  ;;  %1790 = vmatprep.subr.mxu1 %v1957_v0 }
  0x44   :  { %1792 = vmatprep.mubr.msk.f32.mxu1 %vm1958_vm0, %v1957_v0  ;;  %1791 = vmatpush3.msra.mxu1 %v72_v15 }
  0x45   :  { %1788 = vmatmul.mubr.msk.f32.vlgmr.msra.gmra.mrb[6].mxu0 %vm81_vm1, %v63_v14  ;;  %1795 = vmatprep.subr.mxu0 %v1957_v0 }
  0x46   :  { %1797 = vmatprep.mubr.msk.f32.mxu0 %vm1958_vm0, %v1957_v0  ;;  %1800 = vmatprep.subr.mxu1 %v1957_v0 }
  0x47   :  { %1793 = vmatmul.mubr.msk.f32.vlgmr.msra.gmra.mrb[6].mxu1 %vm81_vm1, %v64_v16 }
  0x48   :  { %1802 = vmatprep.mubr.msk.f32.mxu1 %vm1958_vm0, %v1957_v0 }
 0x10c   :  { %v151_v17 = vpop.f32.mrb[0].mxu0 }
 0x10d   :  { %v666_v18 = vmul.f32 0.35355338, %v151_v17  ;;  %v1759_v19 = vpop.f32.mrb[1].mxu0 }
 0x10e   :  { %v224_v20 = vpop.f32.mrb[0].mxu1 }
 0x10f   :  { %v667_v21 = vmul.f32 0.35355338, %v224_v20  ;;  %v674_v22 = vsel %vm81_vm1, %v666_v18, -inf  ;;  %v1764_v23 = vpop.f32.mrb[1].mxu1 }
 0x110   :  { %675 = vmax.xlane.f32.xlu0 %v674_v22  ;;  %v297_v24 = vpop.f32.mrb[2].mxu0 }
 0x111   :  { %v668_v25 = vmul.f32 0.35355338, %v297_v24  ;;  %v1769_v26 = vpop.f32.mrb[3].mxu0  ;;  %v677_v27 = vsel %vm81_vm1, %v667_v21, -inf }
 0x112   :  { %v370_v28 = vpop.f32.mrb[2].mxu1  ;;  %v73_v26 = vld [vmem:[#allocation6] sm:$0xff] }
 0x113   :  { %v669_v29 = vmul.f32 0.35355338, %v370_v28  ;;  %v680_v30 = vsel %vm81_vm1, %v668_v25, -inf  ;;  %v1774_v31 = vpop.f32.mrb[3].mxu1  ;;  %1796 = vmatpush3.msra.mxu0 %v73_v26 }
 0x114   :  { %678 = vmax.xlane.f32.xlu0 %v677_v27  ;;  %681 = vmax.xlane.f32.xlu1 %v680_v30  ;;  %v443_v32 = vpop.f32.mrb[4].mxu0  ;;  %v74_v27 = vld [vmem:[#allocation6 + $0x8] sm:$0xff] }
 0x115   :  { %v670_v33 = vmul.f32 0.35355338, %v443_v32  ;;  %v1779_v34 = vpop.f32.mrb[5].mxu0  ;;  %v683_v35 = vsel %vm81_vm1, %v669_v29, -inf  ;;  %1805 = vmatprep.subr.mxu0 %v1957_v0  ;;  %1801 = vmatpush3.msra.mxu1 %v74_v27 }
 0x116   :  { %v516_v36 = vpop.f32.mrb[4].mxu1  ;;  %1810 = vmatprep.subr.mxu1 %v1957_v0 }
 0x117   :  { %v671_v37 = vmul.f32 0.35355338, %v516_v36  ;;  %v686_v38 = vsel %vm81_vm1, %v670_v33, -inf  ;;  %v1784_v39 = vpop.f32.mrb[5].mxu1  ;;  %v75_v36 = vld [vmem:[#allocation6 + $0x10] sm:$0xff] }
 0x118   :  { %684 = vmax.xlane.f32.xlu1 %v683_v35  ;;  %687 = vmax.xlane.f32.xlu0 %v686_v38  ;;  %v589_v40 = vpop.f32.mrb[6].mxu0  ;;  %v1351_v39 = vlaneseq }
 0x119   :  { %v672_v41 = vmul.f32 0.35355338, %v589_v40  ;;  %v689_v42 = vsel %vm81_vm1, %v671_v37, -inf  ;;  %v1789_v43 = vpop.f32.mrb[7].mxu0 }
 0x11a   :  { %v662_v44 = vpop.f32.mrb[6].mxu1 }
 0x11b   :  { %v673_v45 = vmul.f32 0.35355338, %v662_v44  ;;  %v692_v46 = vsel %vm81_vm1, %v672_v41, -inf  ;;  %v1794_v47 = vpop.f32.mrb[7].mxu1 }
 0x11c   :  { %690 = vmax.xlane.f32.xlu1 %v689_v42  ;;  %693 = vmax.xlane.f32.xlu0 %v692_v46  ;;  %v1352_v47 = vshrl.u32 %v1351_v39, 7 }
 0x11d   :  { %v695_v48 = vsel %vm81_vm1, %v673_v45, -inf }
 0x120   :  { %696 = vmax.xlane.f32.xlu1 %v695_v48 }
 0x19d   :  { %v676_v49 = vpop.xlane.xlu0 %675 }
 0x19e   :  { %v698_v50 = vsub.f32 %v666_v18, %v676_v49  ;;  %v77_v49 = vld [vmem:[#allocation6 + $0x20] sm:$0xff] }
 0x1a0   :  { %v706_v51 = vmul.f32 1.442695, %v698_v50 }
 0x1a1   :  { %v679_v52 = vpop.xlane.xlu0 %678  ;;  %v682_v53 = vpop.xlane.xlu1 %681 }
 0x1a2   :  { %1850 = vpow2.f32 %v706_v51  ;;  %v699_v54 = vsub.f32 %v667_v21, %v679_v52  ;;  %v700_v55 = vsub.f32 %v668_v25, %v682_v53  ;;  %v78_v53 = vld [vmem:[#allocation6 + $0x28] sm:$0xff] }
 0x1a4   :  { %v708_v56 = vmul.f32 1.442695, %v699_v54  ;;  %v710_v57 = vmul.f32 1.442695, %v700_v55 }
 0x1a5   :  { %v685_v58 = vpop.xlane.xlu1 %684  ;;  %v688_v59 = vpop.xlane.xlu0 %687 }
 0x1a6   :  { %1852 = vpow2.f32 %v708_v56  ;;  %v701_v60 = vsub.f32 %v669_v29, %v685_v58  ;;  %v702_v61 = vsub.f32 %v670_v33, %v688_v59 }
 0x1a7   :  { %1854 = vpow2.f32 %v710_v57  ;;  %v79_v57 = vld [vmem:[#allocation6 + $0x30] sm:$0xff] }
 0x1a8   :  { %v712_v62 = vmul.f32 1.442695, %v701_v60  ;;  %v714_v63 = vmul.f32 1.442695, %v702_v61  ;;  %v1960_v60 = vmov 1934713408  }
 0x1a9   :  { %v691_v1 = vpop.xlane.xlu1 %690  ;;  %v694_v2 = vpop.xlane.xlu0 %693  ;;  %v1413_v61 = vunpack.c.l.s4 %v1960_v60 }
 0x1aa   :  { %1856 = vpow2.f32 %v712_v62  ;;  %v703_v3 = vsub.f32 %v671_v37, %v691_v1  ;;  %v704_v4 = vsub.f32 %v672_v41, %v694_v2  ;;  %v1959_v37 = vmov 1983009808   ;;  %v80_v2 = vld [vmem:[#allocation6 + $0x38] sm:$0xff] }
 0x1ab   :  { %1858 = vpow2.f32 %v714_v63  ;;  %v1349_v38 = vunpack.c.l.s4 %v1959_v37 }
 0x1ac   :  { %v1851_v5 = vpop.eup %1850  ;;  %v716_v6 = vmul.f32 1.442695, %v703_v3  ;;  %v718_v7 = vmul.f32 1.442695, %v704_v4 }
 0x1ad   :  { %v697_v8 = vpop.xlane.xlu1 %696  ;;  %v722_v9 = vsel %vm81_vm1, %v1851_v5, 0.0  ;;  %v1350_v46 = vunpack.c.0.s8 %v1349_v38 }
 0x1ae   :  { %1860 = vpow2.f32 %v716_v6  ;;  %v705_v10 = vsub.f32 %v673_v45, %v697_v8  ;;  %723 = vadd.xlane.f32.xlu0 %v722_v9  ;;  %v76_v45 = vld [vmem:[#allocation6 + $0x18] sm:$0xff]  ;;  %v1414_v9 = vunpack.c.0.s8 %v1413_v61 }
 0x1af   :  { %1862 = vpow2.f32 %v718_v7  ;;  %v2123_v54 = vsub.s32 %v1350_v46, %v1352_v47 }
 0x1b0   :  { %v1853_v11 = vpop.eup %1852  ;;  %v720_v12 = vmul.f32 1.442695, %v705_v10 }
 0x1b1   :  { %v1855_v13 = vpop.eup %1854  ;;  %v725_v14 = vsel %vm81_vm1, %v1853_v11, 0.0 }
 0x1b2   :  { %1864 = vpow2.f32 %v720_v12  ;;  %726 = vadd.xlane.f32.xlu1 %v725_v14  ;;  %v728_v15 = vsel %vm81_vm1, %v1855_v13, 0.0 }
 0x1b3   :  { %729 = vadd.xlane.f32.xlu0 %v728_v15 }
 0x1b4   :  { %v1857_v16 = vpop.eup %1856 }
 0x1b5   :  { %v2093_v17 = vpop.eup %1858  ;;  %v731_v18 = vsel %vm81_vm1, %v1857_v16, 0.0 }
 0x1b6   :  { %732 = vadd.xlane.f32.xlu1 %v731_v18  ;;  %v734_v19 = vsel %vm81_vm1, %v2093_v17, 0.0 }
 0x1b7   :  { %735 = vadd.xlane.f32.xlu0 %v734_v19 }
 0x1b8   :  { %v2098_v20 = vpop.eup %1860 }
 0x1b9   :  { %v2100_v21 = vpop.eup %1862  ;;  %v737_v22 = vsel %vm81_vm1, %v2098_v20, 0.0 }
 0x1ba   :  { %738 = vadd.xlane.f32.xlu1 %v737_v22  ;;  %v740_v23 = vsel %vm81_vm1, %v2100_v21, 0.0 }
 0x1bb   :  { %741 = vadd.xlane.f32.xlu0 %v740_v23 }
 0x1bc   :  { %v2106_v24 = vpop.eup %1864 }
 0x1bd   :  { %v743_v25 = vsel %vm81_vm1, %v2106_v24, 0.0 }
 0x1be   :  { %744 = vadd.xlane.f32.xlu1 %v743_v25 }
 0x23b   :  { %v724_v28 = vpop.xlane.xlu0 %723 }
 0x23c   :  { %1866 = vrcp.f32 %v724_v28 }
 0x23f   :  { %v727_v29 = vpop.xlane.xlu1 %726 }
 0x240   :  { %1868 = vrcp.f32 %v727_v29  ;;  %v730_v30 = vpop.xlane.xlu0 %729 }
 0x241   :  { %1870 = vrcp.f32 %v730_v30 }
 0x243   :  { %v733_v31 = vpop.xlane.xlu1 %732 }
 0x244   :  { %1872 = vrcp.f32 %v733_v31  ;;  %v736_v32 = vpop.xlane.xlu0 %735 }
 0x245   :  { %1874 = vrcp.f32 %v736_v32 }
 0x246   :  { %v1867_v33 = vpop.eup %1866 }
 0x247   :  { %v2112_v34 = vmul.f32 %v1867_v33, %v1851_v5  ;;  %v739_v35 = vpop.xlane.xlu1 %738 }
 0x248   :  { %1876 = vrcp.f32 %v739_v35  ;;  %v742_v40 = vpop.xlane.xlu0 %741 }
 0x249   :  { %1878 = vrcp.f32 %v742_v40  ;;  %1798 = vmatmul.mubr.msk.f32.vlgmr.msra.gmra.mrb[8].mxu0 %vm81_vm1, %v2112_v34 }
 0x24a   :  { %v1869_v41 = vpop.eup %1868  ;;  %1806 = vmatpush3.msra.mxu0 %v75_v36  ;;  %1807 = vmatprep.mubr.msk.f32.mxu0 %vm1958_vm0, %v1957_v0 }
 0x24b   :  { %v1871_v42 = vpop.eup %1870  ;;  %v749_v43 = vmul.f32 %v1869_v41, %v1853_v11  ;;  %v745_v44 = vpop.xlane.xlu1 %744  ;;  %1815 = vmatprep.subr.mxu0 %v1957_v0 }
 0x24c   :  { %v751_v48 = vmul.f32 %v1871_v42, %v1855_v13  ;;  %1880 = vrcp.f32 %v745_v44 }
 0x24d   :  { %1803 = vmatmul.mubr.msk.f32.vlgmr.msra.gmra.mrb[8].mxu1 %vm81_vm1, %v749_v43 }
 0x24e   :  { %v1873_v50 = vpop.eup %1872  ;;  %1808 = vmatmul.mubr.msk.f32.vlgmr.msra.gmra.mrb[10].mxu0 %vm81_vm1, %v751_v48  ;;  %1811 = vmatpush3.msra.mxu1 %v76_v45  ;;  %v1526_v55 = vcombine.high %v2112_v34, %v751_v48  ;;  %v1525_v6 = vcombine.low %v2112_v34, %v751_v48 }
 0x24f   :  { %v1875_v51 = vpop.eup %1874  ;;  %v753_v52 = vmul.f32 %v1873_v50, %v1857_v16  ;;  %1812 = vmatprep.mubr.msk.f32.mxu1 %vm1958_vm0, %v1957_v0  ;;  %1816 = vmatpush3.msra.mxu0 %v77_v49 }
 0x250   :  { %v755_v56 = vmul.f32 %v1875_v51, %v2093_v17  ;;  %1817 = vmatprep.mubr.msk.f32.mxu0 %vm1958_vm0, %v1957_v0  ;;  %1820 = vmatprep.subr.mxu1 %v1957_v0  ;;  %v1540_v3 = vrot.slane %v1526_v55, %v2123_v54  ;;  %v1533_v14 = vrot.slane %v1525_v6, %v2123_v54 }
 0x251   :  { %1813 = vmatmul.mubr.msk.f32.vlgmr.msra.gmra.mrb[10].mxu1 %vm81_vm1, %v753_v52  ;;  %1825 = vmatprep.subr.mxu0 %v1957_v0  ;;  %v1542_v58 = vcombine.high %v749_v43, %v753_v52  ;;  %v1541_v62 = vcombine.low %v749_v43, %v753_v52  ;;  %v2151_v17 = vsub.s32 %v1414_v9, %v1352_v47 }
 0x252   :  { %v1877_v59 = vpop.eup %1876  ;;  %1818 = vmatmul.mubr.msk.f32.vlgmr.msra.gmra.mrb[12].mxu0 %vm81_vm1, %v755_v56  ;;  %1821 = vmatpush3.msra.mxu1 %v78_v53 }
 0x253   :  { %v1879_v63 = vpop.eup %1878  ;;  %v757_v1 = vmul.f32 %v1877_v59, %v2098_v20  ;;  %1822 = vmatprep.mubr.msk.f32.mxu1 %vm1958_vm0, %v1957_v0  ;;  %1826 = vmatpush3.msra.mxu0 %v79_v57  ;;  %v1556_v4 = vrot.slane %v1542_v58, %v2123_v54  ;;  %v1549_v10 = vrot.slane %v1541_v62, %v2123_v54 }
 0x254   :  { %v759_v5 = vmul.f32 %v1879_v63, %v2100_v21  ;;  %1827 = vmatprep.mubr.msk.f32.mxu0 %vm1958_vm0, %v1957_v0  ;;  %1830 = vmatprep.subr.mxu1 %v1957_v0 }
 0x255   :  { %1823 = vmatmul.mubr.msk.f32.vlgmr.msra.gmra.mrb[12].mxu1 %vm81_vm1, %v757_v1  ;;  %v1606_v7 = vcombine.high %v1540_v3, %v1556_v4  ;;  %v1589_v18 = vcombine.low %v1533_v14, %v1549_v10  ;;  %v1590_v27 = vcombine.high %v1533_v14, %v1549_v10  ;;  %v1605_v38 = vcombine.low %v1540_v3, %v1556_v4 }
 0x256   :  { %v1881_v8 = vpop.eup %1880  ;;  %1828 = vmatmul.mubr.msk.f32.vlgmr.msra.gmra.mrb[14].mxu0 %vm81_vm1, %v759_v5  ;;  %1831 = vmatpush3.msra.mxu1 %v80_v2  ;;  %v1557_v12 = vcombine.low %v755_v56, %v759_v5  ;;  %v1558_v13 = vcombine.high %v755_v56, %v759_v5 }
 0x257   :  { %v761_v11 = vmul.f32 %v1881_v8, %v2106_v24  ;;  %1832 = vmatprep.mubr.msk.f32.mxu1 %vm1958_vm0, %v1957_v0  ;;  %v2158_v25 = vrot.slane %v1589_v18, %v2151_v17  ;;  %v2167_v29 = vrot.slane %v1606_v7, %v2151_v17  ;;  %v1604_v34 = vrot.slane %v1590_v27, %v2151_v17 }
 0x258   :  { %v1565_v19 = vrot.slane %v1557_v12, %v2123_v54  ;;  %v1572_v21 = vrot.slane %v1558_v13, %v2123_v54  ;;  %v1613_v41 = vrot.slane %v1605_v38, %v2151_v17 }
 0x259   :  { %1833 = vmatmul.mubr.msk.f32.vlgmr.msra.gmra.mrb[14].mxu1 %vm81_vm1, %v761_v11  ;;  %v1573_v15 = vcombine.low %v757_v1, %v761_v11  ;;  %v1574_v16 = vcombine.high %v757_v1, %v761_v11 }
 0x25b   :  { %v1581_v20 = vrot.slane %v1573_v15, %v2123_v54  ;;  %v1588_v22 = vrot.slane %v1574_v16, %v2123_v54 }
 0x25d   :  { %v1621_v0 = vcombine.low %v1565_v19, %v1581_v20  ;;  %v1622_v23 = vcombine.high %v1565_v19, %v1581_v20  ;;  %v1638_v24 = vcombine.high %v1572_v21, %v1588_v22  ;;  %v1637_v37 = vcombine.low %v1572_v21, %v1588_v22 }
 0x25f   :  { %v2161_v26 = vrot.slane %v1621_v0, %v2151_v17  ;;  %v2164_v28 = vrot.slane %v1638_v24, %v2151_v17  ;;  %v1636_v32 = vrot.slane %v1622_v23, %v2151_v17  ;;  %v1645_v40 = vrot.slane %v1637_v37, %v2151_v17 }
 0x261   :  { %v1654_v30 = vcombine.high %v2158_v25, %v2161_v26  ;;  %v1653_v31 = vcombine.low %v2158_v25, %v2161_v26  ;;  %v1659_v33 = vcombine.low %v2167_v29, %v2164_v28  ;;  %v1660_v35 = vcombine.high %v2167_v29, %v2164_v28 }
 0x262   :  { %v1655_v36 = vcombine.low %v1604_v34, %v1636_v32  ;;  %v1656_v39 = vcombine.high %v1604_v34, %v1636_v32  ;;  %v1657_v42 = vcombine.low %v1613_v41, %v1645_v40  ;;  %v1658_v43 = vcombine.high %v1613_v41, %v1645_v40 }
 0x263   :  { %1662 = vrot.lane.b32.xlu1 %v1654_v30, %s1955_s28 }
 0x267   :  { %1666 = vrot.lane.b32.xlu1 %v1655_v36, %s1961_s2 }
 0x26b   :  { %1670 = vrot.lane.b32.xlu1 %v1656_v39, %s1962_s25 }
 0x26f   :  { %1674 = vrot.lane.b32.xlu1 %v1657_v42, %s1963_s26 }
 0x273   :  { %1678 = vrot.lane.b32.xlu1 %v1658_v43, %s1964_s27 }
 0x31c   :  { %v831_v44 = vpop.f32.mrb[8].mxu0 }
 0x31d   :  { %v1799_v45 = vpop.f32.mrb[9].mxu0 }
 0x320   :  { %v904_v46 = vpop.f32.mrb[8].mxu1 }
 0x321   :  { %v977_v47 = vpop.f32.mrb[10].mxu0  ;;  %v1804_v48 = vpop.f32.mrb[9].mxu1 }
 0x322   :  { %v1346_v49 = vcombine.low %v831_v44, %v977_v47  ;;  %v1347_v50 = vcombine.high %v831_v44, %v977_v47  ;;  %v1809_v51 = vpop.f32.mrb[11].mxu0 }
 0x324   :  { %v1050_v52 = vpop.f32.mrb[10].mxu1  ;;  %v1354_v59 = vrot.slane %v1346_v49, %v2123_v54  ;;  %v1361_v60 = vrot.slane %v1347_v50, %v2123_v54 }
 0x325   :  { %v1362_v53 = vcombine.low %v904_v46, %v1050_v52  ;;  %v1363_v55 = vcombine.high %v904_v46, %v1050_v52  ;;  %v1123_v56 = vpop.f32.mrb[12].mxu0  ;;  %v1814_v57 = vpop.f32.mrb[11].mxu1 }
 0x326   :  { %v1819_v58 = vpop.f32.mrb[13].mxu0 }
 0x327   :  { %v1370_v61 = vrot.slane %v1362_v53, %v2123_v54  ;;  %v1377_v62 = vrot.slane %v1363_v55, %v2123_v54 }
 0x328   :  { %v1196_v63 = vpop.f32.mrb[12].mxu1 }
 0x329   :  { %v1411_v1 = vcombine.high %v1354_v59, %v1370_v61  ;;  %v1426_v2 = vcombine.low %v1361_v60, %v1377_v62  ;;  %v1427_v3 = vcombine.high %v1361_v60, %v1377_v62  ;;  %v1269_v4 = vpop.f32.mrb[14].mxu0  ;;  %v1824_v5 = vpop.f32.mrb[13].mxu1  ;;  %v1410_v6 = vcombine.low %v1354_v59, %v1370_v61 }
 0x32a   :  { %v1378_v7 = vcombine.low %v1123_v56, %v1269_v4  ;;  %v1379_v8 = vcombine.high %v1123_v56, %v1269_v4  ;;  %v1829_v9 = vpop.f32.mrb[15].mxu0 }
 0x32b   :  { %v1425_v0 = vrot.slane %v1411_v1, %v2151_v17  ;;  %v1418_v23 = vrot.slane %v1410_v6, %v2151_v17  ;;  %v1434_v34 = vrot.slane %v1426_v2, %v2151_v17 }
 0x32c   :  { %v1342_v10 = vpop.f32.mrb[14].mxu1  ;;  %v1386_v14 = vrot.slane %v1378_v7, %v2123_v54  ;;  %v1393_v15 = vrot.slane %v1379_v8, %v2123_v54 }
 0x32d   :  { %v1394_v11 = vcombine.low %v1196_v63, %v1342_v10  ;;  %v1395_v12 = vcombine.high %v1196_v63, %v1342_v10  ;;  %v1834_v13 = vpop.f32.mrb[15].mxu1 }
 0x32f   :  { %v1402_v16 = vrot.slane %v1394_v11, %v2123_v54  ;;  %v1409_v18 = vrot.slane %v1395_v12, %v2123_v54  ;;  %v1441_v54 = vrot.slane %v1427_v3, %v2151_v17 }
 0x331   :  { %v1443_v19 = vcombine.high %v1386_v14, %v1402_v16  ;;  %v1458_v20 = vcombine.low %v1393_v15, %v1409_v18  ;;  %v1459_v21 = vcombine.high %v1393_v15, %v1409_v18  ;;  %v1442_v22 = vcombine.low %v1386_v14, %v1402_v16 }
 0x333   :  { %v1457_v24 = vrot.slane %v1443_v19, %v2151_v17  ;;  %v1450_v27 = vrot.slane %v1442_v22, %v2151_v17  ;;  %v1466_v30 = vrot.slane %v1458_v20, %v2151_v17  ;;  %v1473_v32 = vrot.slane %v1459_v21, %v2151_v17  ;;  %v1663_v17 = vpop.permute.xlu1 %1662 }
 0x334   :  { %v1689_v28 = vsel %vm81_vm1, %v1653_v31, %v1663_v17 }
 0x335   :  { %v1476_v36 = vcombine.low %v1425_v0, %v1457_v24  ;;  %v1475_v37 = vcombine.high %v1418_v23, %v1450_v27  ;;  %v1474_v38 = vcombine.low %v1418_v23, %v1450_v27  ;;  %v1477_v39 = vcombine.high %v1425_v0, %v1457_v24 }
 0x336   :  { %v1478_v40 = vcombine.low %v1434_v34, %v1466_v30  ;;  %v1479_v41 = vcombine.high %v1434_v34, %v1466_v30  ;;  %v1480_v42 = vcombine.low %v1441_v54, %v1473_v32  ;;  %v1481_v43 = vcombine.high %v1441_v54, %v1473_v32 }
 0x337   :  { %1487 = vrot.lane.b32.xlu1 %v1476_v36, %s1961_s2  ;;  %1483 = vrot.lane.b32.xlu0 %v1475_v37, %s1955_s28  ;;  %v1667_v44 = vpop.permute.xlu1 %1666 }
 0x338   :  { %v1690_v29 = vsel %vm1511_vm2, %v1689_v28, %v1667_v44 }
 0x33b   :  { %1682 = vrot.lane.b32.xlu1 %v1659_v33, %s1965_s29  ;;  %1491 = vrot.lane.b32.xlu0 %v1477_v39, %s1962_s25  ;;  %v1671_v45 = vpop.permute.xlu1 %1670 }
 0x33c   :  { %v1691_v50 = vsel %vm1513_vm3, %v1690_v29, %v1671_v45 }
 0x33f   :  { %1686 = vrot.lane.b32.xlu1 %v1660_v35, %s1966_s30  ;;  %1495 = vrot.lane.b32.xlu0 %v1478_v40, %s1963_s26  ;;  %v1675_v46 = vpop.permute.xlu1 %1674 }
 0x340   :  { %v1692_v51 = vsel %vm1515_vm4, %v1691_v50, %v1675_v46 }
 0x343   :  { %1499 = vrot.lane.b32.xlu0 %v1479_v41, %s1964_s27  ;;  %v1679_v47 = vpop.permute.xlu1 %1678 }
 0x344   :  { %v1693_v52 = vsel %vm1517_vm5, %v1692_v51, %v1679_v47 }
 0x347   :  { %1503 = vrot.lane.b32.xlu0 %v1480_v42, %s1965_s29 }
 0x34b   :  { %1507 = vrot.lane.b32.xlu0 %v1481_v43, %s1966_s30 }
 0x3a9   :  { %v1488_v48 = vpop.permute.xlu1 %1487  ;;  %v1484_v33 = vpop.permute.xlu0 %1483 }
 0x3aa   :  { %v1510_v56 = vsel %vm81_vm1, %v1474_v38, %v1484_v33 }
 0x3ab   :  { %v1512_v57 = vsel %vm1511_vm2, %v1510_v56, %v1488_v48 }
 0x3ad   :  { %v1683_v35 = vpop.permute.xlu1 %1682  ;;  %v1492_v49 = vpop.permute.xlu0 %1491 }
 0x3ae   :  { %v1694_v53 = vsel %vm1519_vm6, %v1693_v52, %v1683_v35  ;;  %v1514_v59 = vsel %vm1513_vm3, %v1512_v57, %v1492_v49 }
 0x3b1   :  { %v1687_v25 = vpop.permute.xlu1 %1686  ;;  %v1496_v26 = vpop.permute.xlu0 %1495 }
 0x3b2   :  { %v1695_v31 = vsel %vm1521_vm7, %v1694_v53, %v1687_v25  ;;  %v1516_v60 = vsel %vm1515_vm4, %v1514_v59, %v1496_v26 }
 0x3b3   :  { %1696 = vst.msk [vmem:[%s2242_s4] sm:$0xff] %vm1523_vm8, %v1695_v31 }
 0x3b5   :  { %v1500_v55 = vpop.permute.xlu0 %1499 }
 0x3b6   :  { %v1518_v61 = vsel %vm1517_vm5, %v1516_v60, %v1500_v55 }
 0x3b9   :  { %v1504_v58 = vpop.permute.xlu0 %1503 }
 0x3ba   :  { %v1520_v62 = vsel %vm1519_vm6, %v1518_v61, %v1504_v58 }
 0x3bd   :  { %v1508_v63 = vpop.permute.xlu0 %1507 }
 0x3be   :  { %v1522_v1 = vsel %vm1521_vm7, %v1520_v62, %v1508_v63 }
 0x3bf   :  { %1524 = vst.msk [vmem:[%s2241_s3] sm:$0xff] %vm1523_vm8, %v1522_v1 }
 0x3c0   :  { %1705 = vsyncpa [#allocation3], 1 }
 0x3c1   :  { %1706 = vsyncpa [#allocation5], 1 }

</bundles_post_ra>
